<compile_context>
chip_gen: v5e
topology: v5e:2x2
jax: 0.10.0
libtpu: 0.0.40
codegen_flags: <defaults>
</compile_context>

<pallas_src>
import jax
import jax.numpy as jnp
from jax import lax
from jax.experimental import pallas as pl
from jax.experimental.pallas import tpu as pltpu

_LANE = 128
_SUBLANE = 8
_CHUNK_ROWS = 256               # rows folded per fori_loop iteration (32 vregs / operand)
_TARGET_BLOCK_BYTES = 4 << 20   # ~4 MiB of each input per grid step
_VMEM_LIMIT_BYTES = 40 << 20    # 16 MiB of double-buffered inputs + slack; safe on 64 MiB v7x


def _cdiv(a, b):
    return -(-a // b)


def _round_up(a, b):
    return _cdiv(a, b) * b


def _tensorcores_per_device():
    # 2 TensorCores behind one device on v4 / v5p / v7x-class chips; 1 on v5e / v6e.
    try:
        kind = jax.devices()[0].device_kind.lower()
    except Exception:
        return 1
    if any(tag in kind for tag in ("v4", "v5p", "v7", "tpu7")):
        return 2
    return 1


def _make_sq_sum_kernel(steps, block_rows, chunk_rows, valid_rows, needs_mask):
    """sum((x - y)^2) over this core's row range -> scalar written on the last step."""
    n_chunks = block_rows // chunk_rows

    def kernel(x_ref, y_ref, out_ref, acc_ref):
        p = pl.program_id(0)
        t = pl.program_id(1)

        @pl.when(t == 0)
        def _():
            acc_ref[...] = jnp.zeros_like(acc_ref)

        # First global row this grid step would cover (pre-clamp); used for masking.
        row0 = (p * steps + t) * block_rows

        def chunk_body(c, acc):
            r0 = pl.multiple_of(c * chunk_rows, chunk_rows)
            xd = x_ref[pl.ds(r0, chunk_rows), :].astype(jnp.float32)
            yd = y_ref[pl.ds(r0, chunk_rows), :].astype(jnp.float32)
            d = xd - yd
            sq = d * d
            if needs_mask:
                rid = row0 + r0 + lax.broadcasted_iota(
                    jnp.int32, (chunk_rows, _LANE), 0)
                sq = jnp.where(rid < valid_rows, sq, 0.0)
            # Fold (chunk_rows,128) -> (8,128) with pure VPU adds (tile-aligned reshape).
            return acc + sq.reshape(chunk_rows // _SUBLANE, _SUBLANE, _LANE).sum(axis=0)

        part = lax.fori_loop(0, n_chunks, chunk_body,
                             jnp.zeros((_SUBLANE, _LANE), jnp.float32))
        acc_ref[...] += part

        @pl.when(t == steps - 1)
        def _():
            # One XLU reduce per core, hidden under the last DMA.
            out_ref[...] = jnp.sum(acc_ref[...]).reshape(1, 1, 1)

    return kernel


@jax.jit
def rmse_loss(x, y):
    assert x.shape == y.shape, "RMSELoss requires matching shapes"
    n = x.size
    # TODO(synk): float64 inputs are accumulated in float32 (diverges from torch double MSELoss).

    xf = jnp.ravel(x)
    yf = jnp.ravel(y)

    itemsize = xf.dtype.itemsize
    sub_mult = max(_SUBLANE, 32 // itemsize)          # 8 f32 / 16 bf16 / 32 int8-fp8
    target_rows = max(sub_mult, _TARGET_BLOCK_BYTES // (_LANE * itemsize))

    # Zero-pad ONLY when the flat size is not lane-aligned (pad contributes 0 to the
    # sum of squares; the mean divides by the true n).  Lane-aligned inputs (the
    # common case) take the copy-free path regardless of block size.
    if n % _LANE != 0:
        padded_n = _round_up(n, _LANE * sub_mult)
        xf = jnp.pad(xf, (0, padded_n - n))
        yf = jnp.pad(yf, (0, padded_n - n))
    else:
        padded_n = n
    rows = padded_n // _LANE

    if rows <= _CHUNK_ROWS:
        block_rows = _round_up(rows, sub_mult)
        chunk_rows = block_rows
    else:
        block_rows = min(target_rows, _round_up(rows, _CHUNK_ROWS))
        chunk_rows = _CHUNK_ROWS

    total_blocks = _cdiv(rows, block_rows)
    # 2-way core split only on 2-TC devices and only with >= 2 full blocks per core.
    num_cores = 2 if (_tensorcores_per_device() >= 2 and total_blocks >= 4) else 1
    steps = _cdiv(total_blocks, num_cores)
    needs_mask = (num_cores * steps * block_rows) != rows

    x2d = xf.reshape(rows, _LANE)
    y2d = yf.reshape(rows, _LANE)

    last_block = total_blocks - 1
    # Clamp so no grid step DMAs a fully out-of-bounds block; clamped duplicates and
    # partial edge blocks are zeroed by the in-kernel row mask.
    in_idx = lambda p, t: (jnp.minimum(p * steps + t, last_block), 0)

    kernel = _make_sq_sum_kernel(steps, block_rows, chunk_rows, rows, needs_mask)

    partials = pl.pallas_call(
        kernel,
        out_shape=jax.ShapeDtypeStruct((num_cores, 1, 1), jnp.float32),
        grid_spec=pltpu.PrefetchScalarGridSpec(
            num_scalar_prefetch=0,
            grid=(num_cores, steps),
            in_specs=[
                pl.BlockSpec((block_rows, _LANE), in_idx),
                pl.BlockSpec((block_rows, _LANE), in_idx),
            ],
            out_specs=pl.BlockSpec((1, 1, 1), lambda p, t: (p, 0, 0)),
            scratch_shapes=[pltpu.VMEM((_SUBLANE, _LANE), jnp.float32)],
        ),
        compiler_params=pltpu.CompilerParams(
            dimension_semantics=("parallel", "arbitrary"),
            vmem_limit_bytes=_VMEM_LIMIT_BYTES,
        ),
    )(x2d, y2d)

    mse = jnp.sum(partials) / jnp.float32(n)
    return jnp.sqrt(mse)


if __name__ == "__main__":
    key = jax.random.PRNGKey(0)
    k1, k2, k3, k4, k5, k6 = jax.random.split(key, 6)

    # Typical regression target, e.g. NCHW images (lane-aligned, copy-free path).
    x = jax.random.normal(k1, (2, 4, 16, 16), dtype=jnp.float32)
    y = jax.random.normal(k2, (2, 4, 16, 16), dtype=jnp.float32)
    loss = jax.block_until_ready(rmse_loss(x, y))
    ref = jnp.sqrt(jnp.mean((x - y) ** 2))
    assert jnp.allclose(loss, ref, atol=1e-6, rtol=1e-6), (loss, ref)

    # Ragged size (exercises the small lane-pad path).
    x2 = jax.random.normal(k3, (3, 5, 7), dtype=jnp.float32)
    y2 = jax.random.normal(k4, (3, 5, 7), dtype=jnp.float32)
    loss2 = jax.block_until_ready(rmse_loss(x2, y2))
    ref2 = jnp.sqrt(jnp.mean((x2 - y2) ** 2))
    assert jnp.allclose(loss2, ref2, atol=1e-6, rtol=1e-6), (loss2, ref2)

    # Lane-aligned but block-unaligned (exercises multi-step accumulation, the
    # chunked fori_loop, edge partial blocks, and the in-kernel row mask).
    x3 = jax.random.normal(k5, (2, 9, 256, 256), dtype=jnp.float32)
    y3 = jax.random.normal(k6, (2, 9, 256, 256), dtype=jnp.float32)
    loss3 = jax.block_until_ready(rmse_loss(x3, y3))
    ref3 = jnp.sqrt(jnp.mean((x3 - y3) ** 2))
    assert jnp.allclose(loss3, ref3, atol=1e-5, rtol=1e-5), (loss3, ref3)

    print("KERNEL_OK")
</pallas_src>

<mosaic_0001>
module attributes {stable_mosaic.version = 11 : i64} {
  func.func @kernel(%arg0: i32, %arg1: i32, %arg2: memref<16x128xf32, #tpu.memory_space<vmem>>, %arg3: memref<16x128xf32, #tpu.memory_space<vmem>>, %arg4: memref<1x1x1xf32, #tpu.memory_space<vmem>>, %arg5: memref<8x128xf32, #tpu.memory_space<vmem>>) attributes {dimension_semantics = [#tpu.dimension_semantics<parallel>, #tpu.dimension_semantics<arbitrary>], iteration_bounds = array<i64: 1, 1>, scalar_prefetch = 0 : i64, scratch_operands = 1 : i64, tpu.core_type = #tpu.core_type<tc>, window_params = [{transform_indices = @transform_0, window_bounds = array<i64: 16, 128>}, {transform_indices = @transform_1, window_bounds = array<i64: 16, 128>}, {transform_indices = @transform_2, window_bounds = array<i64: 1, 1, 1>}]} {
    %c0_i32 = arith.constant 0 : i32
    %0 = arith.cmpi eq, %arg1, %c0_i32 : i32
    %1 = arith.extui %0 : i1 to i32
    %c0_i32_0 = arith.constant 0 : i32
    %2 = arith.cmpi ne, %1, %c0_i32_0 : i32
    scf.if %2 {
      %cst_10 = arith.constant 0.000000e+00 : f32
      %21 = vector.broadcast %cst_10 : f32 to vector<8x128xf32>
      %c0_11 = arith.constant 0 : index
      %c0_12 = arith.constant 0 : index
      %22 = vector.load %arg5[%c0_11, %c0_12] : memref<8x128xf32, #tpu.memory_space<vmem>>, vector<8x128xf32>
      tpu.vector_store %arg5[%c0_11, %c0_12], %21 {strides = array<i32>} : memref<8x128xf32, #tpu.memory_space<vmem>>, vector<8x128xf32>,
    } else {
    }
    %cst = arith.constant 0.000000e+00 : f32
    %3 = vector.broadcast %cst : f32 to vector<8x128xf32>
    %c0_i32_1 = arith.constant 0 : i32
    %c16_i32 = arith.constant 16 : i32
    %4 = arith.muli %c0_i32_1, %c16_i32 : i32
    %5 = tpu.assume_multiple %4, 16 : i32
    %6 = arith.index_cast %5 : i32 to index
    %c0 = arith.constant 0 : index
    %7 = vector.load %arg2[%6, %c0] : memref<16x128xf32, #tpu.memory_space<vmem>>, vector<16x128xf32>
    %8 = arith.index_cast %5 : i32 to index
    %c0_2 = arith.constant 0 : index
    %9 = vector.load %arg3[%8, %c0_2] : memref<16x128xf32, #tpu.memory_space<vmem>>, vector<16x128xf32>
    %10 = arith.subf %7, %9 : vector<16x128xf32>
    %11 = arith.mulf %10, %10 : vector<16x128xf32>
    %12 = vector.shape_cast %11 : vector<16x128xf32> to vector<2x8x128xf32>
    %cst_3 = arith.constant dense<0.000000e+00> : vector<8x128xf32>
    %13 = vector.multi_reduction <add>, %12, %cst_3 [0] : vector<2x8x128xf32> to vector<8x128xf32>
    %14 = arith.addf %3, %13 : vector<8x128xf32>
    %c1_i32 = arith.constant 1 : i32
    %c0_4 = arith.constant 0 : index
    %c0_5 = arith.constant 0 : index
    %15 = vector.load %arg5[%c0_4, %c0_5] : memref<8x128xf32, #tpu.memory_space<vmem>>, vector<8x128xf32>
    %16 = arith.addf %15, %14 : vector<8x128xf32>
    %c0_6 = arith.constant 0 : index
    %c0_7 = arith.constant 0 : index
    %17 = vector.load %arg5[%c0_6, %c0_7] : memref<8x128xf32, #tpu.memory_space<vmem>>, vector<8x128xf32>
    tpu.vector_store %arg5[%c0_6, %c0_7], %16 {strides = array<i32>} : memref<8x128xf32, #tpu.memory_space<vmem>>, vector<8x128xf32>,
    %c0_i32_8 = arith.constant 0 : i32
    %18 = arith.cmpi eq, %arg1, %c0_i32_8 : i32
    %19 = arith.extui %18 : i1 to i32
    %c0_i32_9 = arith.constant 0 : i32
    %20 = arith.cmpi ne, %19, %c0_i32_9 : i32
    scf.if %20 {
      %c0_10 = arith.constant 0 : index
      %c0_11 = arith.constant 0 : index
      %21 = vector.load %arg5[%c0_10, %c0_11] : memref<8x128xf32, #tpu.memory_space<vmem>>, vector<8x128xf32>
      %22 = vector.shape_cast %21 : vector<8x128xf32> to vector<1x8x128xf32>
      %cst_12 = arith.constant dense<0.000000e+00> : vector<1xf32>
      %23 = vector.multi_reduction <add>, %22, %cst_12 [1, 2] : vector<1x8x128xf32> to vector<1xf32>
      %24 = vector.shape_cast %23 : vector<1xf32> to vector<1x1x1xf32>
      %25 = vector.extract %24[0, 0, 0] : f32 from vector<1x1x1xf32>
      %26 = vector.broadcast %25 : f32 to vector<1x1x1xf32>
      %c0_13 = arith.constant 0 : index
      %c0_14 = arith.constant 0 : index
      %c0_15 = arith.constant 0 : index
      %27 = vector.load %arg4[%c0_13, %c0_14, %c0_15] : memref<1x1x1xf32, #tpu.memory_space<vmem>>, vector<1x1x1xf32>
      tpu.vector_store %arg4[%c0_13, %c0_14, %c0_15], %26 {strides = array<i32>} : memref<1x1x1xf32, #tpu.memory_space<vmem>>, vector<1x1x1xf32>,
    } else {
    }
    return
  }
  func.func @transform_0(%arg0: i32, %arg1: i32) -> (i32, i32) {
    %c1_i32 = arith.constant 1 : i32
    %0 = arith.muli %arg0, %c1_i32 : i32
    %1 = arith.addi %0, %arg1 : i32
    %c0_i32 = arith.constant 0 : i32
    %2 = arith.minsi %1, %c0_i32 : i32
    %c0_i32_0 = arith.constant 0 : i32
    %c0_i32_1 = arith.constant 0 : i32
    return %2, %c0_i32_0 : i32, i32
  }
  func.func @transform_1(%arg0: i32, %arg1: i32) -> (i32, i32) {
    %c1_i32 = arith.constant 1 : i32
    %0 = arith.muli %arg0, %c1_i32 : i32
    %1 = arith.addi %0, %arg1 : i32
    %c0_i32 = arith.constant 0 : i32
    %2 = arith.minsi %1, %c0_i32 : i32
    %c0_i32_0 = arith.constant 0 : i32
    %c0_i32_1 = arith.constant 0 : i32
    return %2, %c0_i32_0 : i32, i32
  }
  func.func @transform_2(%arg0: i32, %arg1: i32) -> (i32, i32, i32) {
    %c0_i32 = arith.constant 0 : i32
    %c0_i32_0 = arith.constant 0 : i32
    %c0_i32_1 = arith.constant 0 : i32
    return %arg0, %c0_i32, %c0_i32_0 : i32, i32, i32
  }
}

</mosaic_0001>

<bundles_post_ra>
// kernel: rmse_loss.1
= control target key start
LH: loop header
LB: loop body
LE: loop exit
PB: predicated region body
PF: predicated region fallthrough
CT: control target
= control target key end

     0   :  { %s198_s0 = inlined_call_operand.vmem [shape: f32[16,128], index: 0, kind: input, shape index: {}]   ;;  %s199_s1 = inlined_call_operand.vmem [shape: f32[16,128], index: 1, kind: input, shape index: {}]   ;;  %s200_s2 = inlined_call_operand.hbm [shape: f32[1,1,1], index: 2, kind: output, shape index: {}]  }
   0x1   :  { %v81_v0 = vld [vmem:[%s198_s0] sm:$0xff]  ;;  %v82_v1 = vld [vmem:[%s198_s0 + $0x8] sm:$0xff] }
   0x2   :  { %v83_v2 = vld [vmem:[%s199_s1] sm:$0xff]  ;;  %v84_v3 = vld [vmem:[%s199_s1 + $0x8] sm:$0xff] }
   0x3   :  { %v85_v4 = vsub.f32 %v81_v0, %v83_v2 }
   0x4   :  { %7 = vsyncpa [#allocation4], 0  ;;  %v86_v5 = vsub.f32 %v82_v1, %v84_v3  ;;  %s167_s0 = smov [#allocation3]   ;;  %s117_s1 = sshll.u32 %s200_s2, 4  ;;  %vm108_vm0 = vcmask 0   ;;  %s118_s1 = int_to_ptr.hbm [resolvable:$true] %s117_s1 }
   0x5   :  { %v87_v6 = vmul.f32 %v85_v4, %v85_v4  ;;  %s115_s17 = sshll.u32 %s167_s0, 4  ;;  %s116_s17 = int_to_ptr.vmem [resolvable:$true] %s115_s17 }
   0x6   :  { %v88_v7 = vmul.f32 %v86_v5, %v86_v5 }
   0x8   :  { %v89_v8 = vadd.f32 %v88_v7, %v87_v6 }
   0xa   :  { %98 = vadd.xlane.f32.xlu0 %v89_v8 }
  0x7d   :  { %v99_v9 = vpop.xlane.xlu0 %98 }
  0x7e   :  { %v100_v10 = vrot.slane %v99_v9, 4 }
  0x80   :  { %v101_v11 = vadd.f32 %v100_v10, %v99_v9 }
  0x82   :  { %v102_v12 = vrot.slane %v101_v11, 2 }
  0x84   :  { %v103_v13 = vadd.f32 %v102_v12, %v101_v11 }
  0x86   :  { %v104_v14 = vrot.slane %v103_v13, 1 }
  0x88   :  { %v105_v15 = vadd.f32 %v104_v14, %v103_v13 }
  0x8a   :  { %138 = vpush %v105_v15 }
  0xbb   :  { %s139_s20 = spop %138 }
  0xbc   :  { %v107_v16 = vstv %s139_s20 }
  0xbd   :  { %109 = vst.msk [vmem:[#allocation3] sm:$0x1] %vm108_vm0, %v107_v16 }
  0xbe   :  { %120 = dma.vmem_to_hbm [thread:$0]  %s116_s17, 16, %s118_s1, [#allocation4]  }
  0xbf   :  { %165 = dma.done.wait [#allocation4], 16  }
  0xc0   :  { %166 = vsyncadd [#allocation4], 4294967280 }
  0xc1   :  { %125 = vsyncpa [#allocation4], 1 }

</bundles_post_ra>
